<compile_context>
chip_gen: v6e
topology: v6e:2x2x1
jax: 0.10.0
libtpu: 0.0.40
codegen_flags: <defaults>
</compile_context>

<pallas_src>
import functools

import jax
import jax.numpy as jnp
from jax.experimental import pallas as pl
from jax.experimental.pallas import tpu as pltpu


def _sge_kernel(x_ref, w_ref, b_ref, o_ref, *, cg, hw, hwp):
    # x_ref / o_ref: (TG, cg*hwp) blocks -- group rows on sublanes, cg channel
    # segments (each hwp lanes, hwp % 128 == 0) concatenated along lanes.
    # w_ref / b_ref: (TG, 1) f32 per-group-row affine parameters.
    tg = x_ref.shape[0]
    inv_hw = jnp.float32(1.0 / hw)

    # AdaptiveAvgPool2d(1) + channel contraction:
    #   t[g, s] = sum_c x[g, c, s] * mean_s' x[g, c, s']
    # Done per lane-segment so only one (TG, hwp) f32 temp is live at a time.
    t = jnp.zeros((tg, hwp), jnp.float32)
    for ci in range(cg):
        seg = x_ref[:, pl.ds(ci * hwp, hwp)].astype(jnp.float32)   # (TG, hwp)
        avg = jnp.sum(seg, axis=1, keepdims=True) * inv_hw         # (TG, 1)
        t = t + seg * avg

    # Normalize over the true hw positions (torch.std uses Bessel's correction).
    t_mean = jnp.sum(t, axis=1, keepdims=True) * inv_hw            # (TG, 1)
    tc = t - t_mean
    if hwp != hw:
        # Padded lanes hold x == 0 -> t == 0 -> tc == -t_mean; mask them out
        # of the variance (the mean above is already correct: zeros add 0).
        lane = jax.lax.broadcasted_iota(jnp.int32, tc.shape, 1)
        tc = jnp.where(lane < hw, tc, jnp.float32(0.0))
    var = jnp.sum(tc * tc, axis=1, keepdims=True) * jnp.float32(1.0 / (hw - 1))
    std = jnp.sqrt(var) + jnp.float32(1e-5)
    tn = tc * pl.reciprocal(std, approx=False)                     # (TG, hwp)

    # Per-group affine then sigmoid gate (f32 stats); cast the gate once so the
    # big elementwise multiply runs in the I/O dtype (bf16 for bf16 inputs).
    gate = jax.nn.sigmoid(tn * w_ref[...] + b_ref[...])            # (TG, hwp)
    gate_io = gate.astype(o_ref.dtype)
    for ci in range(cg):
        sl = pl.ds(ci * hwp, hwp)
        o_ref[:, sl] = x_ref[:, sl] * gate_io


def _choose_tg(bg, row_bytes):
    """Group-rows per block. TG divides bg and is a multiple of 8 (or == bg)
    so block sublane dims satisfy the (8,128) rule."""
    target = 4 << 20      # ~4 MiB input block: per-step overhead ~10% even at
                          # v7x's 3.2 TB/s HBM (review item)
    min_block = 1 << 20
    max_rows = 2048       # keeps the (TG,1) f32 param blocks <= ~1 MiB each
    cands = [d for d in range(1, bg + 1)
             if bg % d == 0 and (d % 8 == 0 or d == bg)]
    small = [d for d in cands if d <= max_rows] or [min(cands)]
    fit = [d for d in small if d * row_bytes <= target] or [min(small)]
    # Prefer >= 8 grid steps (>= 4 per TensorCore on v7x) as long as blocks
    # stay >= ~1 MiB; single-TC chips just take the largest fitting block.
    deep = [d for d in fit if bg // d >= 8 and d * row_bytes >= min_block]
    return max(deep) if deep else max(fit)


def spatial_group_enhance(x, weight, bias, groups=8):
    """x: (b, c, h, w); weight/bias: (1, groups, 1, 1). Returns (b, c, h, w).

    The pallas_call contract is the flat (b*groups, cg*hw_pad) layout; the
    NCHW reshape below is the only wrapper-side layout change (one reshape,
    plus a zero-pad of the spatial axis only when h*w % 128 != 0).
    """
    b, c, h, w = x.shape
    assert c % groups == 0, "channels must be divisible by groups"
    cg = c // groups
    hw = h * w
    assert hw > 1, "1x1 spatial input makes the Bessel-corrected std undefined"

    bg = b * groups
    hwp = ((hw + 127) // 128) * 128  # lane-dense spatial extent
    if hwp == hw:
        x2 = x.reshape(bg, cg * hw)
    else:
        x3 = jnp.pad(x.reshape(bg, cg, hw), ((0, 0), (0, 0), (0, hwp - hw)))
        x2 = x3.reshape(bg, cg * hwp)

    tg = _choose_tg(bg, cg * hwp * x.dtype.itemsize)
    n_blocks = bg // tg

    wg = weight.reshape(groups).astype(jnp.float32)
    bgp = bias.reshape(groups).astype(jnp.float32)
    if tg % groups == 0:
        # Group pattern is identical inside every block -> one tiny constant
        # (tg, 1) block, fetched once by the pipeline (index_map is constant).
        reps = tg // groups
        wt = jnp.tile(wg, (reps,)).reshape(tg, 1)
        bt = jnp.tile(bgp, (reps,)).reshape(tg, 1)
        w_spec = pl.BlockSpec((tg, 1), lambda i: (0, 0))
    else:
        # tg < groups (tg | bg): slice a per-row parameter array per block.
        wt = jnp.tile(wg, (b,)).reshape(bg, 1)
        bt = jnp.tile(bgp, (b,)).reshape(bg, 1)
        w_spec = pl.BlockSpec((tg, 1), lambda i: (i, 0))

    kernel = functools.partial(_sge_kernel, cg=cg, hw=hw, hwp=hwp)
    out2 = pl.pallas_call(
        kernel,
        out_shape=jax.ShapeDtypeStruct((bg, cg * hwp), x.dtype),
        grid=(n_blocks,),
        in_specs=[
            pl.BlockSpec((tg, cg * hwp), lambda i: (i, 0)),
            w_spec,
            w_spec,
        ],
        out_specs=pl.BlockSpec((tg, cg * hwp), lambda i: (i, 0)),
        compiler_params=pltpu.CompilerParams(
            dimension_semantics=("parallel",),
            vmem_limit_bytes=48 * 1024 * 1024,
        ),
    )(x2, wt, bt)

    if hwp == hw:
        return out2.reshape(b, c, h, w)
    out3 = out2.reshape(bg, cg, hwp)[:, :, :hw]
    return out3.reshape(b, c, h, w)


def _reference(x, weight, bias, groups):
    # Pure-JAX reference mirroring the PyTorch forward (compute in f32).
    b, c, h, w = x.shape
    xf = x.astype(jnp.float32)
    xg = xf.reshape(b * groups, c // groups, h, w)
    avg = xg.mean(axis=(2, 3), keepdims=True)
    xn = (xg * avg).sum(axis=1, keepdims=True)
    t = xn.reshape(b * groups, -1)
    t = t - t.mean(axis=1, keepdims=True)
    std = jnp.std(t, axis=1, keepdims=True, ddof=1) + 1e-5
    t = t / std
    t = t.reshape(b, groups, h, w)
    t = t * weight + bias
    t = t.reshape(b * groups, 1, h, w)
    out = xg * jax.nn.sigmoid(t)
    return out.reshape(b, c, h, w).astype(x.dtype)


if __name__ == "__main__":
    groups = 8
    key = jax.random.PRNGKey(0)
    kx, kw, kb, k2, k3 = jax.random.split(key, 5)

    # nn.Parameter(torch.zeros(1, groups, 1, 1)) shapes; small non-zero values
    # so the normalization path is actually exercised.
    weight = 0.1 * jax.random.normal(kw, (1, groups, 1, 1), dtype=jnp.float32)
    bias = 0.1 * jax.random.normal(kb, (1, groups, 1, 1), dtype=jnp.float32)

    # Primary small f32 case (cg=2: previously 4x sublane-padded, now dense).
    b, c, h, w = 2, 16, 16, 16
    x = jax.random.normal(kx, (b, c, h, w), dtype=jnp.float32)
    out = jax.block_until_ready(spatial_group_enhance(x, weight, bias, groups))
    ref = _reference(x, weight, bias, groups)
    assert out.shape == (b, c, h, w)
    assert jnp.allclose(out, ref, atol=1e-5, rtol=1e-5), "f32 mismatch vs reference"

    # hw not a multiple of 128 -> lane-padded + masked-variance path.
    xp = jax.random.normal(k3, (2, 16, 10, 10), dtype=jnp.float32)
    outp = jax.block_until_ready(spatial_group_enhance(xp, weight, bias, groups))
    refp = _reference(xp, weight, bias, groups)
    assert jnp.allclose(outp, refp, atol=1e-5, rtol=1e-5), "padded-hw mismatch"

    # Multi-block grid path: bg=128 group rows -> 8 grid steps of ~1 MiB blocks.
    xm = jax.random.normal(k2, (16, 128, 32, 32), dtype=jnp.float32)
    outm = jax.block_until_ready(spatial_group_enhance(xm, weight, bias, groups))
    refm = _reference(xm, weight, bias, groups)
    assert jnp.allclose(outm, refm, atol=1e-4, rtol=1e-4), "multi-block mismatch"

    # bf16 I/O path (stats in f32, gating multiply in bf16).
    xb = x.astype(jnp.bfloat16)
    outb = jax.block_until_ready(spatial_group_enhance(xb, weight, bias, groups))
    refb = _reference(xb, weight, bias, groups)
    assert jnp.allclose(outb.astype(jnp.float32), refb.astype(jnp.float32),
                        atol=3e-2, rtol=3e-2), "bf16 mismatch"

    print("KERNEL_OK")
</pallas_src>

<mosaic_0001>
module attributes {stable_mosaic.version = 11 : i64} {
  func.func @_sge_kernel(%arg0: i32, %arg1: memref<16x512xf32, #tpu.memory_space<vmem>>, %arg2: memref<16x1xf32, #tpu.memory_space<vmem>>, %arg3: memref<16x1xf32, #tpu.memory_space<vmem>>, %arg4: memref<16x512xf32, #tpu.memory_space<vmem>>) attributes {dimension_semantics = [#tpu.dimension_semantics<parallel>], iteration_bounds = array<i64: 1>, scalar_prefetch = 0 : i64, scratch_operands = 0 : i64, tpu.core_type = #tpu.core_type<tc>, window_params = [{transform_indices = @transform_0, window_bounds = array<i64: 16, 512>}, {pipeline_mode = #tpu.pipeline_mode<synchronous>, transform_indices = @transform_1, window_bounds = array<i64: 16, 1>}, {pipeline_mode = #tpu.pipeline_mode<synchronous>, transform_indices = @transform_2, window_bounds = array<i64: 16, 1>}, {transform_indices = @transform_3, window_bounds = array<i64: 16, 512>}]} {
    %cst = arith.constant 0.000000e+00 : f32
    %0 = vector.broadcast %cst : f32 to vector<16x256xf32>
    %c0 = arith.constant 0 : index
    %c0_0 = arith.constant 0 : index
    %1 = vector.load %arg1[%c0, %c0_0] : memref<16x512xf32, #tpu.memory_space<vmem>>, vector<16x256xf32>
    %cst_1 = arith.constant dense<0.000000e+00> : vector<16xf32>
    %2 = vector.multi_reduction <add>, %1, %cst_1 [1] : vector<16x256xf32> to vector<16xf32>
    %3 = vector.shape_cast %2 : vector<16xf32> to vector<16x1xf32>
    %cst_2 = arith.constant 3.906250e-03 : f32
    %4 = vector.broadcast %cst_2 : f32 to vector<16x1xf32>
    %5 = arith.mulf %3, %4 : vector<16x1xf32>
    %6 = vector.broadcast %5 : vector<16x1xf32> to vector<16x256xf32>
    %7 = arith.mulf %1, %6 : vector<16x256xf32>
    %8 = arith.addf %0, %7 : vector<16x256xf32>
    %c0_3 = arith.constant 0 : index
    %c256 = arith.constant 256 : index
    %9 = vector.load %arg1[%c0_3, %c256] : memref<16x512xf32, #tpu.memory_space<vmem>>, vector<16x256xf32>
    %cst_4 = arith.constant dense<0.000000e+00> : vector<16xf32>
    %10 = vector.multi_reduction <add>, %9, %cst_4 [1] : vector<16x256xf32> to vector<16xf32>
    %11 = vector.shape_cast %10 : vector<16xf32> to vector<16x1xf32>
    %cst_5 = arith.constant 3.906250e-03 : f32
    %12 = vector.broadcast %cst_5 : f32 to vector<16x1xf32>
    %13 = arith.mulf %11, %12 : vector<16x1xf32>
    %14 = vector.broadcast %13 : vector<16x1xf32> to vector<16x256xf32>
    %15 = arith.mulf %9, %14 : vector<16x256xf32>
    %16 = arith.addf %8, %15 : vector<16x256xf32>
    %cst_6 = arith.constant dense<0.000000e+00> : vector<16xf32>
    %17 = vector.multi_reduction <add>, %16, %cst_6 [1] : vector<16x256xf32> to vector<16xf32>
    %18 = vector.shape_cast %17 : vector<16xf32> to vector<16x1xf32>
    %cst_7 = arith.constant 3.906250e-03 : f32
    %19 = vector.broadcast %cst_7 : f32 to vector<16x1xf32>
    %20 = arith.mulf %18, %19 : vector<16x1xf32>
    %21 = vector.broadcast %20 : vector<16x1xf32> to vector<16x256xf32>
    %22 = arith.subf %16, %21 : vector<16x256xf32>
    %23 = arith.mulf %22, %22 : vector<16x256xf32>
    %cst_8 = arith.constant dense<0.000000e+00> : vector<16xf32>
    %24 = vector.multi_reduction <add>, %23, %cst_8 [1] : vector<16x256xf32> to vector<16xf32>
    %25 = vector.shape_cast %24 : vector<16xf32> to vector<16x1xf32>
    %cst_9 = arith.constant 0.00392156886 : f32
    %26 = vector.broadcast %cst_9 : f32 to vector<16x1xf32>
    %27 = arith.mulf %25, %26 : vector<16x1xf32>
    %28 = math.sqrt %27 : vector<16x1xf32>
    %cst_10 = arith.constant 9.99999974E-6 : f32
    %29 = vector.broadcast %cst_10 : f32 to vector<16x1xf32>
    %30 = arith.addf %28, %29 : vector<16x1xf32>
    %31 = tpu.reciprocal %30 : vector<16x1xf32> -> vector<16x1xf32>
    %32 = vector.broadcast %31 : vector<16x1xf32> to vector<16x256xf32>
    %33 = arith.mulf %22, %32 : vector<16x256xf32>
    %c0_11 = arith.constant 0 : index
    %c0_12 = arith.constant 0 : index
    %34 = vector.load %arg2[%c0_11, %c0_12] : memref<16x1xf32, #tpu.memory_space<vmem>>, vector<16x1xf32>
    %35 = vector.broadcast %34 : vector<16x1xf32> to vector<16x256xf32>
    %36 = arith.mulf %33, %35 : vector<16x256xf32>
    %c0_13 = arith.constant 0 : index
    %c0_14 = arith.constant 0 : index
    %37 = vector.load %arg3[%c0_13, %c0_14] : memref<16x1xf32, #tpu.memory_space<vmem>>, vector<16x1xf32>
    %38 = vector.broadcast %37 : vector<16x1xf32> to vector<16x256xf32>
    %39 = arith.addf %36, %38 : vector<16x256xf32>
    %40 = arith.negf %39 : vector<16x256xf32>
    %41 = math.exp %40 : vector<16x256xf32>
    %cst_15 = arith.constant 1.000000e+00 : f32
    %42 = vector.broadcast %cst_15 : f32 to vector<16x256xf32>
    %43 = arith.addf %42, %41 : vector<16x256xf32>
    %44 = arith.divf %42, %43 : vector<16x256xf32>
    %c0_16 = arith.constant 0 : index
    %c0_17 = arith.constant 0 : index
    %45 = vector.load %arg1[%c0_16, %c0_17] : memref<16x512xf32, #tpu.memory_space<vmem>>, vector<16x256xf32>
    %46 = arith.mulf %45, %44 : vector<16x256xf32>
    %c0_18 = arith.constant 0 : index
    %c0_19 = arith.constant 0 : index
    %47 = vector.load %arg4[%c0_18, %c0_19] : memref<16x512xf32, #tpu.memory_space<vmem>>, vector<16x256xf32>
    tpu.vector_store %arg4[%c0_18, %c0_19], %46 {strides = array<i32>} : memref<16x512xf32, #tpu.memory_space<vmem>>, vector<16x256xf32>,
    %c0_20 = arith.constant 0 : index
    %c256_21 = arith.constant 256 : index
    %48 = vector.load %arg1[%c0_20, %c256_21] : memref<16x512xf32, #tpu.memory_space<vmem>>, vector<16x256xf32>
    %49 = arith.mulf %48, %44 : vector<16x256xf32>
    %c0_22 = arith.constant 0 : index
    %c256_23 = arith.constant 256 : index
    %50 = vector.load %arg4[%c0_22, %c256_23] : memref<16x512xf32, #tpu.memory_space<vmem>>, vector<16x256xf32>
    tpu.vector_store %arg4[%c0_22, %c256_23], %49 {strides = array<i32>} : memref<16x512xf32, #tpu.memory_space<vmem>>, vector<16x256xf32>,
    return
  }
  func.func @transform_0(%arg0: i32) -> (i32, i32) {
    %c0_i32 = arith.constant 0 : i32
    %c0_i32_0 = arith.constant 0 : i32
    return %arg0, %c0_i32 : i32, i32
  }
  func.func @transform_1(%arg0: i32) -> (i32, i32) {
    %c0_i32 = arith.constant 0 : i32
    %c0_i32_0 = arith.constant 0 : i32
    %c0_i32_1 = arith.constant 0 : i32
    return %c0_i32, %c0_i32_0 : i32, i32
  }
  func.func @transform_2(%arg0: i32) -> (i32, i32) {
    %c0_i32 = arith.constant 0 : i32
    %c0_i32_0 = arith.constant 0 : i32
    %c0_i32_1 = arith.constant 0 : i32
    return %c0_i32, %c0_i32_0 : i32, i32
  }
  func.func @transform_3(%arg0: i32) -> (i32, i32) {
    %c0_i32 = arith.constant 0 : i32
    %c0_i32_0 = arith.constant 0 : i32
    return %arg0, %c0_i32 : i32, i32
  }
}

</mosaic_0001>

<bundles_post_ra>
// kernel: tpu_custom_call.1
= control target key start
LH: loop header
LB: loop body
LE: loop exit
PB: predicated region body
PF: predicated region fallthrough
CT: control target
= control target key end

     0   :  { %8 = vsyncpa [#allocation3], 0  ;;  %s376_s0 = inlined_call_operand.hbm [shape: f32[16,512], index: 0, kind: input, shape index: {}]   ;;  %s377_s1 = inlined_call_operand.vmem [shape: f32[16,1], index: 1, kind: input, shape index: {}]   ;;  %s378_s2 = inlined_call_operand.vmem [shape: f32[16,1], index: 2, kind: input, shape index: {}]   ;;  %s379_s3 = inlined_call_operand.hbm [shape: f32[16,512], index: 3, kind: output, shape index: {}]  }
   0x1   :  { %9 = vsyncpa [#allocation4], 0  ;;  %s287_s12 = smov [#allocation2]  }
   0x2   :  { %s15_s13 = sshll.u32 %s287_s12, 4  ;;  %s16_s13 = int_to_ptr.vmem [resolvable:$true] %s15_s13 }
   0x3   :  { %s251_s14 = scalar_lea.vmem %s16_s13, 1024  ;;  %p256_p1 = scmp.lt.s32.totalorder %s16_s13, %s16_s13 }
   0x4   :  { %p252_p0 = scmp.ne.s32.totalorder %s16_s13, %s251_s14  ;;  %p257_p2 = scmp.lt.s32.totalorder %s251_s14, %s251_s14 }
   0x6   :  { %p258_p3 = por %p257_p2, %p256_p1 }
   0x8   :  { %p259_p4 = pnand %p258_p3, %p252_p0 }
   0xa   :  { %262 = shalt.err (!%p259_p4)
}
   0xb   :  { %s288_s15 = smov 512   ;;  %s289_s16 = smov 32  }
   0xc   :  { %21 = dma.hbm_to_vmem [thread:$0]  %s376_s0, 1024, %s16_s13, [#allocation3], %s288_s15, %s288_s15, %s289_s16  }
   0xd   :  { %283 = dma.done.wait [#allocation3], 1024  }
   0xe   :  { %284 = vsyncadd [#allocation3], 4294966272  ;;  %v318_v0 = vld [vmem:[#allocation2 + $0x10] sm:$0xff]  ;;  %v320_v1 = vld [vmem:[#allocation2 + $0x18] sm:$0xff]  ;;  %v290_v34 = vmov 0  }
   0xf   :  { %v322_v2 = vld [vmem:[#allocation2] sm:$0xff]  ;;  %v53_v3 = vadd.f32 %v320_v1, %v318_v0  ;;  %v326_v4 = vld [vmem:[#allocation2 + $0x8] sm:$0xff]  ;;  %v328_v5 = vld [vmem:[#allocation2 + $0x30] sm:$0xff]  ;;  %218 = vset.pattern.permute.xlu1 %v290_v34  ;;  %217 = vset.pattern.permute.xlu0 %v290_v34 }
  0x10   :  { %v330_v6 = vld [vmem:[#allocation2 + $0x38] sm:$0xff]  ;;  %v33_v7 = vadd.f32 %v326_v4, %v322_v2  ;;  %v334_v8 = vld [vmem:[#allocation2 + $0x20] sm:$0xff]  ;;  %v336_v9 = vld [vmem:[#allocation2 + $0x28] sm:$0xff] }
  0x11   :  { %54 = vadd.xlane.f32.xlu1 %v53_v3  ;;  %v56_v10 = vadd.f32 %v330_v6, %v328_v5  ;;  %v36_v11 = vadd.f32 %v336_v9, %v334_v8  ;;  %v116_v49 = vld [vmem:[%s377_s1 + $0x8] sm:$0xff]  ;;  %v115_v50 = vld [vmem:[%s377_s1] sm:$0xff]  ;;  %s291_s1 = smov [#allocation5]  }
  0x12   :  { %34 = vadd.xlane.f32.xlu0 %v33_v7  ;;  %v131_v51 = vld [vmem:[%s378_s2] sm:$0xff]  ;;  %v132_v52 = vld [vmem:[%s378_s2 + $0x8] sm:$0xff]  ;;  %s196_s2 = sshll.u32 %s291_s1, 4  ;;  %s197_s2 = int_to_ptr.vmem [resolvable:$true] %s196_s2 }
  0x13   :  { %s263_s26 = scalar_lea.vmem %s197_s2, 1024  ;;  %p268_p6 = scmp.lt.s32.totalorder %s197_s2, %s197_s2 }
  0x14   :  { %p264_p5 = scmp.ne.s32.totalorder %s197_s2, %s263_s26  ;;  %p269_p7 = scmp.lt.s32.totalorder %s263_s26, %s263_s26 }
  0x15   :  { %57 = vadd.xlane.f32.xlu1 %v56_v10 }
  0x16   :  { %37 = vadd.xlane.f32.xlu0 %v36_v11  ;;  %p270_p8 = por %p269_p7, %p268_p6 }
  0x18   :  { %p271_p9 = pnand %p270_p8, %p264_p5 }
  0x9a   :  { %v55_v12 = vpop.xlane.xlu1 %54 }
  0x9b   :  { %v59_v13 = vmul.f32 0.00390625, %v55_v12  ;;  %v35_v14 = vpop.xlane.xlu0 %34 }
  0x9c   :  { %v39_v15 = vmul.f32 0.00390625, %v35_v14 }
  0x9d   :  { %v61_v16 = vmul.f32 %v59_v13, %v318_v0  ;;  %v62_v17 = vmul.f32 %v59_v13, %v320_v1 }
  0x9e   :  { %v41_v18 = vmul.f32 %v39_v15, %v322_v2  ;;  %v42_v19 = vmul.f32 %v39_v15, %v326_v4  ;;  %v58_v20 = vpop.xlane.xlu1 %57 }
  0x9f   :  { %v60_v21 = vmul.f32 0.00390625, %v58_v20  ;;  %v38_v22 = vpop.xlane.xlu0 %37 }
  0xa0   :  { %v40_v23 = vmul.f32 0.00390625, %v38_v22  ;;  %v65_v24 = vadd.f32 %v61_v16, %v41_v18  ;;  %v66_v25 = vadd.f32 %v62_v17, %v42_v19 }
  0xa1   :  { %v63_v26 = vmul.f32 %v60_v21, %v328_v5  ;;  %v64_v27 = vmul.f32 %v60_v21, %v330_v6 }
  0xa2   :  { %v43_v28 = vmul.f32 %v40_v23, %v334_v8  ;;  %v44_v29 = vmul.f32 %v40_v23, %v336_v9  ;;  %v69_v30 = vadd.f32 %v66_v25, %v65_v24 }
  0xa4   :  { %70 = vadd.xlane.f32.xlu0 %v69_v30  ;;  %v67_v31 = vadd.f32 %v63_v26, %v43_v28  ;;  %v68_v32 = vadd.f32 %v64_v27, %v44_v29 }
  0xa6   :  { %v72_v33 = vadd.f32 %v68_v32, %v67_v31 }
  0xa8   :  { %73 = vadd.xlane.f32.xlu1 %v72_v33 }
 0x12d   :  { %v71_v35 = vpop.xlane.xlu0 %70 }
 0x12e   :  { %v75_v36 = vmul.f32 0.00390625, %v71_v35 }
 0x130   :  { %v77_v37 = vsub.f32 %v65_v24, %v75_v36  ;;  %v78_v38 = vsub.f32 %v66_v25, %v75_v36 }
 0x131   :  { %v74_v39 = vpop.xlane.xlu1 %73 }
 0x132   :  { %v76_v40 = vmul.f32 0.00390625, %v74_v39  ;;  %v81_v41 = vmul.f32 %v77_v37, %v77_v37  ;;  %v82_v42 = vmul.f32 %v78_v38, %v78_v38 }
 0x134   :  { %v79_v43 = vsub.f32 %v67_v31, %v76_v40  ;;  %v80_v44 = vsub.f32 %v68_v32, %v76_v40  ;;  %v85_v45 = vadd.f32 %v82_v42, %v81_v41 }
 0x136   :  { %86 = vadd.xlane.f32.xlu0 %v85_v45  ;;  %v83_v46 = vmul.f32 %v79_v43, %v79_v43  ;;  %v84_v47 = vmul.f32 %v80_v44, %v80_v44 }
 0x138   :  { %v88_v48 = vadd.f32 %v84_v47, %v83_v46 }
 0x13a   :  { %89 = vadd.xlane.f32.xlu1 %v88_v48 }
 0x14b   :  { %124 = vperm.xlu1 %218, %v116_v49  }
 0x14c   :  { %119 = vperm.xlu0 %217, %v115_v50  }
 0x14f   :  { %135 = vperm.xlu1 %218, %v131_v51  }
 0x153   :  { %140 = vperm.xlu1 %218, %v132_v52  }
 0x1bf   :  { %v87_v53 = vpop.xlane.xlu0 %86 }
 0x1c0   :  { %v91_v54 = vmul.f32 0.003921569, %v87_v53 }
 0x1c2   :  { %219 = vrsqrt.f32 %v91_v54  ;;  %vm95_vm0 = vcmp.eq.f32.partialorder %v91_v54, inf  ;;  %v98_v59 = vand.u32 2147483648, %v91_v54  ;;  %vm97_vm1 = vcmp.eq.f32.partialorder %v91_v54, 0.0 }
 0x1c3   :  { %v90_v55 = vpop.xlane.xlu1 %89 }
 0x1c4   :  { %v92_v56 = vmul.f32 0.003921569, %v90_v55 }
 0x1c6   :  { %221 = vrsqrt.f32 %v92_v56  ;;  %vm102_vm2 = vcmp.eq.f32.partialorder %v92_v56, inf  ;;  %v105_v7 = vand.u32 2147483648, %v92_v56  ;;  %vm104_vm3 = vcmp.eq.f32.partialorder %v92_v56, 0.0 }
 0x1c7   :  { %v125_v13 = vpop.permute.xlu1 %124  ;;  %v120_v15 = vpop.permute.xlu0 %119 }
 0x1cb   :  { %v136_v18 = vpop.permute.xlu1 %135 }
 0x1cf   :  { %v220_v57 = vpop.eup %219  ;;  %v141_v30 = vpop.permute.xlu1 %140 }
 0x1d0   :  { %v94_v58 = vmul.f32 %v220_v57, %v91_v54 }
 0x1d2   :  { %v96_v60 = vsel %vm95_vm0, %v91_v54, %v94_v58 }
 0x1d3   :  { %v222_v61 = vpop.eup %221  ;;  %v99_v62 = vsel %vm97_vm1, %v98_v59, %v96_v60 }
 0x1d4   :  { %v101_v63 = vmul.f32 %v222_v61, %v92_v56  ;;  %v107_v3 = vadd.f32 1e-05, %v99_v62 }
 0x1d6   :  { %v103_v10 = vsel %vm102_vm2, %v92_v56, %v101_v63  ;;  %223 = vrcp.f32 %v107_v3 }
 0x1d7   :  { %v106_v11 = vsel %vm104_vm3, %v105_v7, %v103_v10 }
 0x1d8   :  { %v108_v12 = vadd.f32 1e-05, %v106_v11 }
 0x1da   :  { %225 = vrcp.f32 %v108_v12 }
 0x1e3   :  { %v224_v14 = vpop.eup %223 }
 0x1e4   :  { %v111_v16 = vmul.f32 %v224_v14, %v77_v37  ;;  %v112_v17 = vmul.f32 %v224_v14, %v78_v38 }
 0x1e6   :  { %v127_v19 = vmul.f32 %v120_v15, %v111_v16  ;;  %v128_v20 = vmul.f32 %v120_v15, %v112_v17 }
 0x1e7   :  { %v226_v21 = vpop.eup %225 }
 0x1e8   :  { %v113_v22 = vmul.f32 %v226_v21, %v79_v43  ;;  %v114_v23 = vmul.f32 %v226_v21, %v80_v44  ;;  %v143_v24 = vadd.f32 %v136_v18, %v127_v19  ;;  %v144_v25 = vadd.f32 %v136_v18, %v128_v20 }
 0x1ea   :  { %v129_v26 = vmul.f32 %v125_v13, %v113_v22  ;;  %v130_v27 = vmul.f32 %v125_v13, %v114_v23  ;;  %v208_v28 = vmul.f32 -1.442695, %v143_v24  ;;  %v209_v29 = vmul.f32 -1.442695, %v144_v25 }
 0x1ec   :  { %v145_v31 = vadd.f32 %v141_v30, %v129_v26  ;;  %v146_v32 = vadd.f32 %v141_v30, %v130_v27  ;;  %227 = vpow2.f32 %v208_v28 }
 0x1ed   :  { %229 = vpow2.f32 %v209_v29 }
 0x1ee   :  { %v210_v33 = vmul.f32 -1.442695, %v145_v31  ;;  %v211_v34 = vmul.f32 -1.442695, %v146_v32 }
 0x1f0   :  { %231 = vpow2.f32 %v210_v33 }
 0x1f1   :  { %233 = vpow2.f32 %v211_v34 }
 0x1f9   :  { %v228_v35 = vpop.eup %227 }
 0x1fa   :  { %v230_v36 = vpop.eup %229  ;;  %v159_v37 = vadd.f32 1.0, %v228_v35 }
 0x1fb   :  { %v160_v38 = vadd.f32 1.0, %v230_v36 }
 0x1fc   :  { %235 = vrcp.f32 %v159_v37 }
 0x1fd   :  { %v232_v39 = vpop.eup %231  ;;  %237 = vrcp.f32 %v160_v38 }
 0x1fe   :  { %v234_v40 = vpop.eup %233  ;;  %v161_v41 = vadd.f32 1.0, %v232_v39 }
 0x1ff   :  { %v162_v42 = vadd.f32 1.0, %v234_v40 }
 0x200   :  { %239 = vrcp.f32 %v161_v41 }
 0x201   :  { %241 = vrcp.f32 %v162_v42 }
 0x209   :  { %v236_v43 = vpop.eup %235 }
 0x20a   :  { %v238_v44 = vpop.eup %237  ;;  %v171_v45 = vmul.f32 %v236_v43, %v322_v2  ;;  %v183_v46 = vmul.f32 %v236_v43, %v318_v0 }
 0x20b   :  { %v172_v47 = vmul.f32 %v238_v44, %v326_v4  ;;  %v184_v48 = vmul.f32 %v238_v44, %v320_v1 }
 0x20c   :  { %175 = vst [vmem:[#allocation5] sm:$0xff] %v171_v45  ;;  %187 = vst [vmem:[#allocation5 + $0x10] sm:$0xff] %v183_v46 }
 0x20d   :  { %v240_v49 = vpop.eup %239  ;;  %176 = vst [vmem:[#allocation5 + $0x8] sm:$0xff] %v172_v47  ;;  %188 = vst [vmem:[#allocation5 + $0x18] sm:$0xff] %v184_v48 }
 0x20e   :  { %v242_v50 = vpop.eup %241  ;;  %v173_v51 = vmul.f32 %v240_v49, %v334_v8  ;;  %v185_v52 = vmul.f32 %v240_v49, %v328_v5 }
 0x20f   :  { %v174_v2 = vmul.f32 %v242_v50, %v336_v9  ;;  %v186_v0 = vmul.f32 %v242_v50, %v330_v6 }
 0x210   :  { %177 = vst [vmem:[#allocation5 + $0x20] sm:$0xff] %v173_v51  ;;  %189 = vst [vmem:[#allocation5 + $0x30] sm:$0xff] %v185_v52 }
 0x211   :  { %178 = vst [vmem:[#allocation5 + $0x28] sm:$0xff] %v174_v2  ;;  %190 = vst [vmem:[#allocation5 + $0x38] sm:$0xff] %v186_v0 }
 0x212   :  { %274 = shalt.err (!%p271_p9)
}
 0x213   :  { %202 = dma.vmem_to_hbm [thread:$0]  %s197_s2, 1024, %s379_s3, [#allocation4], %s288_s15, %s288_s15, %s289_s16  }
 0x214   :  { %285 = dma.done.wait [#allocation4], 1024  }
 0x215   :  { %286 = vsyncadd [#allocation4], 4294966272 }
 0x216   :  { %206 = vsyncpa [#allocation3], 1 }
 0x217   :  { %207 = vsyncpa [#allocation4], 1 }

</bundles_post_ra>
